<compile_context>
chip_gen: v7x
topology: tpu7x:2x2x1
jax: 0.10.0
libtpu: 0.0.40
codegen_flags: <defaults>
</compile_context>

<pallas_src>
import functools

import jax
import jax.numpy as jnp
from jax.experimental import pallas as pl
from jax.experimental.pallas import tpu as pltpu


_LN_EPS = 1e-5   # torch.nn.LayerNorm default
_LANE = 128
_SUBLANE = 8


def _round_up(x, m):
    return (x + m - 1) // m * m


def _layernorm_padded(x, gamma, beta, f_real):
    """LayerNorm over the last axis where only the first `f_real` lanes are real.

    Padded lanes of x are zero on entry (zero-padded weights/biases) and
    gamma/beta are zero-padded, so padded lanes remain zero on exit.  All
    statistics use the true feature count, matching nn.LayerNorm exactly.
    """
    f_pad = x.shape[-1]
    inv_f = 1.0 / float(f_real)
    mean = jnp.sum(x, axis=-1, keepdims=True) * inv_f
    diff = x - mean
    if f_pad != f_real:
        lane = jax.lax.broadcasted_iota(jnp.int32, x.shape, x.ndim - 1)
        diff = jnp.where(lane < f_real, diff, 0.0)
    var = jnp.sum(diff * diff, axis=-1, keepdims=True) * inv_f
    xhat = diff * jax.lax.rsqrt(var + _LN_EPS)
    return xhat * gamma + beta


def _actor_kernel(*refs, ln, fc1_real, fc2_real, mm_dtype):
    if ln:
        (x_ref, w1_ref, b1_ref, w2_ref, b2_ref, w3_ref, b3_ref,
         g1_ref, be1_ref, g2_ref, be2_ref, out_ref) = refs
    else:
        (x_ref, w1_ref, b1_ref, w2_ref, b2_ref, w3_ref, b3_ref,
         out_ref) = refs

    x = x_ref[...]
    # fc1 + relu  (MXU matmul, f32 accumulate; bias add + relu fused on VPU)
    a = jnp.dot(x.astype(mm_dtype), w1_ref[...],
                preferred_element_type=jnp.float32)
    a = jnp.maximum(a + b1_ref[...], 0.0)
    if ln:
        a = _layernorm_padded(a, g1_ref[...], be1_ref[...], fc1_real)

    # fc2 + relu
    a = jnp.dot(a.astype(mm_dtype), w2_ref[...],
                preferred_element_type=jnp.float32)
    a = jnp.maximum(a + b2_ref[...], 0.0)
    if ln:
        a = _layernorm_padded(a, g2_ref[...], be2_ref[...], fc2_real)

    # mu + tanh  (tanh runs on the EUP slot, essentially free under the MXU)
    mu = jnp.dot(a.astype(mm_dtype), w3_ref[...],
                 preferred_element_type=jnp.float32)
    mu = jnp.tanh(mu + b3_ref[...])
    out_ref[...] = mu.astype(out_ref.dtype)


def prepare_actor_params(params, ln=False, use_bf16=False):
    """One-time weight prep: transpose to (in, out), zero-pad lane dims to 128,
    optionally cast matmul weights to bf16.  Call once per parameter set."""
    fc1_dims, d_in = params["fc1_w"].shape
    fc2_dims = params["fc2_w"].shape[0]
    n_actions = params["mu_w"].shape[0]

    d_in_p = _round_up(d_in, _LANE)
    h1_p = _round_up(fc1_dims, _LANE)
    h2_p = _round_up(fc2_dims, _LANE)
    a_p = _round_up(n_actions, _LANE)

    mm_dtype = jnp.bfloat16 if use_bf16 else jnp.float32

    def pad2(w, rows, cols):
        return jnp.pad(w, ((0, rows - w.shape[0]), (0, cols - w.shape[1])))

    def pad_row(v, cols):
        return jnp.pad(v.reshape(1, -1).astype(jnp.float32),
                       ((0, 0), (0, cols - v.shape[0])))

    w1 = pad2(params["fc1_w"].T.astype(jnp.float32), d_in_p, h1_p).astype(mm_dtype)
    w2 = pad2(params["fc2_w"].T.astype(jnp.float32), h1_p, h2_p).astype(mm_dtype)
    w3 = pad2(params["mu_w"].T.astype(jnp.float32), h2_p, a_p).astype(mm_dtype)
    b1 = pad_row(params["fc1_b"], h1_p)
    b2 = pad_row(params["fc2_b"], h2_p)
    b3 = pad_row(params["mu_b"], a_p)

    arrays = [w1, b1, w2, b2, w3, b3]
    if ln:
        arrays += [
            pad_row(params["ln1_g"], h1_p),
            pad_row(params["ln1_b"], h1_p),
            pad_row(params["ln2_g"], h2_p),
            pad_row(params["ln2_b"], h2_p),
        ]
    arrays = [jax.device_put(a) for a in arrays]

    meta = dict(d_in=d_in, d_in_p=d_in_p,
                fc1_dims=fc1_dims, h1_p=h1_p,
                fc2_dims=fc2_dims, h2_p=h2_p,
                n_actions=n_actions, a_p=a_p,
                ln=ln, mm_dtype=mm_dtype)
    return arrays, meta


def _tile_b(i):
    return (i, 0)


def _resident(i):
    return (0, 0)


def _pick_b_tile(B):
    """Batch tile: single tile (no grid padding waste) for typical RL batches,
    256-row tiles for very large batches.  Always a sublane multiple."""
    b_up = _round_up(B, _SUBLANE)
    return b_up if b_up <= 512 else 256


def actor_forward(state, prepared, *, b_tile=None):
    """Fused forward pass.  `prepared` comes from prepare_actor_params()."""
    arrays, meta = prepared
    B, d_in = state.shape
    assert d_in == meta["d_in"], "state feature dim mismatch"

    if b_tile is None:
        b_tile = _pick_b_tile(B)
    b_tile = _round_up(b_tile, _SUBLANE)
    b_pad = _round_up(B, b_tile)

    d_in_p = meta["d_in_p"]
    h1_p, h2_p, a_p = meta["h1_p"], meta["h2_p"], meta["a_p"]
    ln = meta["ln"]

    x = state.astype(jnp.float32)
    if (b_pad, d_in_p) != (B, d_in):
        x = jnp.pad(x, ((0, b_pad - B), (0, d_in_p - d_in)))

    grid = (b_pad // b_tile,)

    # Activations tiled on B; weights/biases/LN params VMEM-resident
    # (constant index_map => no re-DMA across batch tiles).
    in_specs = [pl.BlockSpec((b_tile, d_in_p), _tile_b)]
    resident_shapes = [
        (d_in_p, h1_p), (1, h1_p),
        (h1_p, h2_p), (1, h2_p),
        (h2_p, a_p), (1, a_p),
    ]
    if ln:
        resident_shapes += [(1, h1_p), (1, h1_p), (1, h2_p), (1, h2_p)]
    for shp in resident_shapes:
        in_specs.append(pl.BlockSpec(shp, _resident))

    kernel = functools.partial(
        _actor_kernel, ln=ln,
        fc1_real=meta["fc1_dims"], fc2_real=meta["fc2_dims"],
        mm_dtype=meta["mm_dtype"])

    out = pl.pallas_call(
        kernel,
        out_shape=jax.ShapeDtypeStruct((b_pad, a_p), jnp.float32),
        grid_spec=pltpu.PrefetchScalarGridSpec(
            num_scalar_prefetch=0,
            grid=grid,
            in_specs=in_specs,
            out_specs=pl.BlockSpec((b_tile, a_p), _tile_b),
        ),
        compiler_params=pltpu.CompilerParams(
            dimension_semantics=("parallel",)),
    )(x, *arrays)

    # Lane-dense slab inside the kernel; slice back to the real shape outside.
    return out[:B, :meta["n_actions"]]


def actor_forward_ref(state, params, ln=False):
    """Pure-JAX reference mirroring the PyTorch module exactly."""
    a = jnp.maximum(state @ params["fc1_w"].T + params["fc1_b"], 0.0)
    if ln:
        m = a.mean(-1, keepdims=True)
        v = ((a - m) ** 2).mean(-1, keepdims=True)
        a = (a - m) / jnp.sqrt(v + _LN_EPS) * params["ln1_g"] + params["ln1_b"]
    a = jnp.maximum(a @ params["fc2_w"].T + params["fc2_b"], 0.0)
    if ln:
        m = a.mean(-1, keepdims=True)
        v = ((a - m) ** 2).mean(-1, keepdims=True)
        a = (a - m) / jnp.sqrt(v + _LN_EPS) * params["ln2_g"] + params["ln2_b"]
    return jnp.tanh(a @ params["mu_w"].T + params["mu_b"])


def init_params(key, input_dim, fc1_dims, fc2_dims, n_actions, ln=False):
    """Deterministic init matching nn.Linear default: U(-1/sqrt(fan_in), 1/sqrt(fan_in))."""
    ks = jax.random.split(key, 6)

    def lin(kw, kb, fan_in, fan_out):
        bound = 1.0 / jnp.sqrt(jnp.float32(fan_in))
        w = jax.random.uniform(kw, (fan_out, fan_in), jnp.float32, -bound, bound)
        b = jax.random.uniform(kb, (fan_out,), jnp.float32, -bound, bound)
        return w, b

    p = {}
    p["fc1_w"], p["fc1_b"] = lin(ks[0], ks[1], input_dim, fc1_dims)
    p["fc2_w"], p["fc2_b"] = lin(ks[2], ks[3], fc1_dims, fc2_dims)
    p["mu_w"], p["mu_b"] = lin(ks[4], ks[5], fc2_dims, n_actions)
    if ln:
        p["ln1_g"] = jnp.ones((fc1_dims,), jnp.float32)
        p["ln1_b"] = jnp.zeros((fc1_dims,), jnp.float32)
        p["ln2_g"] = jnp.ones((fc2_dims,), jnp.float32)
        p["ln2_b"] = jnp.zeros((fc2_dims,), jnp.float32)
    return p


if __name__ == "__main__":
    key = jax.random.PRNGKey(0)
    k_state, k_params, k_big = jax.random.split(key, 3)

    # Small shapes consistent with ActorNetwork(alpha, input_dims=(16,),
    # fc1_dims=32, fc2_dims=32, n_actions=8, ...)
    batch, input_dim, fc1_dims, fc2_dims, n_actions = 8, 16, 32, 32, 8
    state = jax.random.normal(k_state, (batch, input_dim), jnp.float32)

    ok = True

    # f32 path, with and without LayerNorm, small batch (single grid tile).
    for use_ln in (False, True):
        params = init_params(k_params, input_dim, fc1_dims, fc2_dims,
                             n_actions, ln=use_ln)
        prep = prepare_actor_params(params, ln=use_ln)
        out = jax.block_until_ready(actor_forward(state, prep))
        ref = actor_forward_ref(state, params, ln=use_ln)
        if not jnp.allclose(out, ref, atol=1e-5, rtol=1e-5):
            ok = False

    # Larger batch exercising the B-tiled grid (padded batch, multiple tiles).
    big_b = 300
    big_state = jax.random.normal(k_big, (big_b, input_dim), jnp.float32)
    params = init_params(k_params, input_dim, fc1_dims, fc2_dims,
                         n_actions, ln=True)
    prep = prepare_actor_params(params, ln=True)
    out = jax.block_until_ready(actor_forward(big_state, prep, b_tile=128))
    ref = actor_forward_ref(big_state, params, ln=True)
    if not jnp.allclose(out, ref, atol=1e-5, rtol=1e-5):
        ok = False

    # Default tile selection (single-tile path for B=300).
    out = jax.block_until_ready(actor_forward(big_state, prep))
    if not jnp.allclose(out, ref, atol=1e-5, rtol=1e-5):
        ok = False

    # bf16-weight variant (bf16 MXU inputs, f32 accumulate) — looser tolerance.
    prep_bf16 = prepare_actor_params(params, ln=True, use_bf16=True)
    out_bf16 = jax.block_until_ready(
        actor_forward(big_state, prep_bf16, b_tile=128))
    if not jnp.allclose(out_bf16, ref, atol=5e-2, rtol=5e-2):
        ok = False

    if ok:
        print("KERNEL_OK")
</pallas_src>

<mosaic_0001>
module attributes {stable_mosaic.version = 11 : i64} {
  func.func @_actor_kernel(%arg0: i32, %arg1: memref<8x128xf32, #tpu.memory_space<vmem>>, %arg2: memref<128x128xf32, #tpu.memory_space<vmem>>, %arg3: memref<1x128xf32, #tpu.memory_space<vmem>>, %arg4: memref<128x128xf32, #tpu.memory_space<vmem>>, %arg5: memref<1x128xf32, #tpu.memory_space<vmem>>, %arg6: memref<128x128xf32, #tpu.memory_space<vmem>>, %arg7: memref<1x128xf32, #tpu.memory_space<vmem>>, %arg8: memref<8x128xf32, #tpu.memory_space<vmem>>) attributes {dimension_semantics = [#tpu.dimension_semantics<parallel>], iteration_bounds = array<i64: 1>, scalar_prefetch = 0 : i64, scratch_operands = 0 : i64, tpu.core_type = #tpu.core_type<tc>, window_params = [{transform_indices = @transform_0, window_bounds = array<i64: 8, 128>}, {pipeline_mode = #tpu.pipeline_mode<synchronous>, transform_indices = @transform_1, window_bounds = array<i64: 128, 128>}, {pipeline_mode = #tpu.pipeline_mode<synchronous>, transform_indices = @transform_2, window_bounds = array<i64: 1, 128>}, {pipeline_mode = #tpu.pipeline_mode<synchronous>, transform_indices = @transform_3, window_bounds = array<i64: 128, 128>}, {pipeline_mode = #tpu.pipeline_mode<synchronous>, transform_indices = @transform_4, window_bounds = array<i64: 1, 128>}, {pipeline_mode = #tpu.pipeline_mode<synchronous>, transform_indices = @transform_5, window_bounds = array<i64: 128, 128>}, {pipeline_mode = #tpu.pipeline_mode<synchronous>, transform_indices = @transform_6, window_bounds = array<i64: 1, 128>}, {transform_indices = @transform_7, window_bounds = array<i64: 8, 128>}]} {
    %c0 = arith.constant 0 : index
    %c0_0 = arith.constant 0 : index
    %0 = vector.load %arg1[%c0, %c0_0] : memref<8x128xf32, #tpu.memory_space<vmem>>, vector<8x128xf32>
    %c0_1 = arith.constant 0 : index
    %c0_2 = arith.constant 0 : index
    %1 = vector.load %arg2[%c0_1, %c0_2] : memref<128x128xf32, #tpu.memory_space<vmem>>, vector<128x128xf32>
    %cst = arith.constant dense<0.000000e+00> : vector<8x128xf32>
    %2 = tpu.matmul %0, %1, %cst {dimension_numbers = #tpu.dot_dimension_numbers<[1], [0], [0], [1], [0, 0, 1, 1], [], []>} : vector<8x128xf32>, vector<128x128xf32>, vector<8x128xf32> -> vector<8x128xf32>
    %c0_3 = arith.constant 0 : index
    %c0_4 = arith.constant 0 : index
    %3 = vector.load %arg3[%c0_3, %c0_4] : memref<1x128xf32, #tpu.memory_space<vmem>>, vector<1x128xf32>
    %4 = vector.broadcast %3 : vector<1x128xf32> to vector<8x128xf32>
    %5 = arith.addf %2, %4 : vector<8x128xf32>
    %cst_5 = arith.constant 0.000000e+00 : f32
    %6 = vector.broadcast %cst_5 : f32 to vector<8x128xf32>
    %7 = arith.maximumf %5, %6 : vector<8x128xf32>
    %c0_6 = arith.constant 0 : index
    %c0_7 = arith.constant 0 : index
    %8 = vector.load %arg4[%c0_6, %c0_7] : memref<128x128xf32, #tpu.memory_space<vmem>>, vector<128x128xf32>
    %cst_8 = arith.constant dense<0.000000e+00> : vector<8x128xf32>
    %9 = tpu.matmul %7, %8, %cst_8 {dimension_numbers = #tpu.dot_dimension_numbers<[1], [0], [0], [1], [0, 0, 1, 1], [], []>} : vector<8x128xf32>, vector<128x128xf32>, vector<8x128xf32> -> vector<8x128xf32>
    %c0_9 = arith.constant 0 : index
    %c0_10 = arith.constant 0 : index
    %10 = vector.load %arg5[%c0_9, %c0_10] : memref<1x128xf32, #tpu.memory_space<vmem>>, vector<1x128xf32>
    %11 = vector.broadcast %10 : vector<1x128xf32> to vector<8x128xf32>
    %12 = arith.addf %9, %11 : vector<8x128xf32>
    %cst_11 = arith.constant 0.000000e+00 : f32
    %13 = vector.broadcast %cst_11 : f32 to vector<8x128xf32>
    %14 = arith.maximumf %12, %13 : vector<8x128xf32>
    %c0_12 = arith.constant 0 : index
    %c0_13 = arith.constant 0 : index
    %15 = vector.load %arg6[%c0_12, %c0_13] : memref<128x128xf32, #tpu.memory_space<vmem>>, vector<128x128xf32>
    %cst_14 = arith.constant dense<0.000000e+00> : vector<8x128xf32>
    %16 = tpu.matmul %14, %15, %cst_14 {dimension_numbers = #tpu.dot_dimension_numbers<[1], [0], [0], [1], [0, 0, 1, 1], [], []>} : vector<8x128xf32>, vector<128x128xf32>, vector<8x128xf32> -> vector<8x128xf32>
    %c0_15 = arith.constant 0 : index
    %c0_16 = arith.constant 0 : index
    %17 = vector.load %arg7[%c0_15, %c0_16] : memref<1x128xf32, #tpu.memory_space<vmem>>, vector<1x128xf32>
    %18 = vector.broadcast %17 : vector<1x128xf32> to vector<8x128xf32>
    %19 = arith.addf %16, %18 : vector<8x128xf32>
    %20 = math.tanh %19 : vector<8x128xf32>
    %c0_17 = arith.constant 0 : index
    %c0_18 = arith.constant 0 : index
    %21 = vector.load %arg8[%c0_17, %c0_18] : memref<8x128xf32, #tpu.memory_space<vmem>>, vector<8x128xf32>
    tpu.vector_store %arg8[%c0_17, %c0_18], %20 {strides = array<i32>} : memref<8x128xf32, #tpu.memory_space<vmem>>, vector<8x128xf32>,
    return
  }
  func.func @transform_0(%arg0: i32) -> (i32, i32) {
    %c0_i32 = arith.constant 0 : i32
    %c0_i32_0 = arith.constant 0 : i32
    return %arg0, %c0_i32 : i32, i32
  }
  func.func @transform_1(%arg0: i32) -> (i32, i32) {
    %c0_i32 = arith.constant 0 : i32
    %c0_i32_0 = arith.constant 0 : i32
    %c0_i32_1 = arith.constant 0 : i32
    return %c0_i32, %c0_i32_0 : i32, i32
  }
  func.func @transform_2(%arg0: i32) -> (i32, i32) {
    %c0_i32 = arith.constant 0 : i32
    %c0_i32_0 = arith.constant 0 : i32
    %c0_i32_1 = arith.constant 0 : i32
    return %c0_i32, %c0_i32_0 : i32, i32
  }
  func.func @transform_3(%arg0: i32) -> (i32, i32) {
    %c0_i32 = arith.constant 0 : i32
    %c0_i32_0 = arith.constant 0 : i32
    %c0_i32_1 = arith.constant 0 : i32
    return %c0_i32, %c0_i32_0 : i32, i32
  }
  func.func @transform_4(%arg0: i32) -> (i32, i32) {
    %c0_i32 = arith.constant 0 : i32
    %c0_i32_0 = arith.constant 0 : i32
    %c0_i32_1 = arith.constant 0 : i32
    return %c0_i32, %c0_i32_0 : i32, i32
  }
  func.func @transform_5(%arg0: i32) -> (i32, i32) {
    %c0_i32 = arith.constant 0 : i32
    %c0_i32_0 = arith.constant 0 : i32
    %c0_i32_1 = arith.constant 0 : i32
    return %c0_i32, %c0_i32_0 : i32, i32
  }
  func.func @transform_6(%arg0: i32) -> (i32, i32) {
    %c0_i32 = arith.constant 0 : i32
    %c0_i32_0 = arith.constant 0 : i32
    %c0_i32_1 = arith.constant 0 : i32
    return %c0_i32, %c0_i32_0 : i32, i32
  }
  func.func @transform_7(%arg0: i32) -> (i32, i32) {
    %c0_i32 = arith.constant 0 : i32
    %c0_i32_0 = arith.constant 0 : i32
    return %arg0, %c0_i32 : i32, i32
  }
}

</mosaic_0001>

<bundles_post_ra>
// kernel: tpu_custom_call.1
= control target key start
LH: loop header
LB: loop body
LE: loop exit
PB: predicated region body
PF: predicated region fallthrough
CT: control target
= control target key end

     0   :  { %12 = vsyncpa [#allocation3], 0  ;;  %s900_s0 = inlined_call_operand.hbm [shape: f32[8,128], index: 0, kind: input, shape index: {}]   ;;  %s901_s1 = inlined_call_operand.hbm [shape: f32[128,128], index: 1, kind: input, shape index: {}]   ;;  %s902_s2 = inlined_call_operand.vmem [shape: f32[1,128], index: 2, kind: input, shape index: {}]   ;;  %s903_s3 = inlined_call_operand.hbm [shape: f32[128,128], index: 3, kind: input, shape index: {}]   ;;  %s904_s4 = inlined_call_operand.vmem [shape: f32[1,128], index: 4, kind: input, shape index: {}]   ;;  %s905_s5 = inlined_call_operand.hbm [shape: f32[128,128], index: 5, kind: input, shape index: {}]   ;;  %s906_s6 = inlined_call_operand.vmem [shape: f32[1,128], index: 6, kind: input, shape index: {}]   ;;  %s907_s7 = inlined_call_operand.hbm [shape: f32[8,128], index: 7, kind: output, shape index: {}]  }
   0x1   :  { %13 = vsyncpa [#allocation6], 0 }
   0x2   :  { %14 = vsyncpa [#allocation9], 0 }
   0x3   :  { %15 = vsyncpa [#allocation4], 0  ;;  %s742_s24 = smov [#allocation5]   ;;  %s624_s28 = scalar_lea.hbm %s901_s1, 2048 }
   0x4   :  { %s31_s25 = sshll.u32 %s742_s24, 4  ;;  %p625_p0 = scmp.ne.s32.totalorder %s901_s1, %s624_s28  ;;  %s32_s25 = int_to_ptr.vmem [resolvable:$true] %s31_s25 }
   0x5   :  { %p628_p1 = scmp.lt.u32.totalorder %s624_s28, %s901_s1 }
   0x7   :  { %p630_p2 = pnand %p628_p1, %p625_p0 }
   0x9   :  { %633 = shalt.err (!%p630_p2)
}
   0xa   :  { %s634_s10 = scalar_lea.vmem %s32_s25, 2048  ;;  %p639_p4 = scmp.lt.s32.totalorder %s32_s25, %s32_s25 }
   0xb   :  { %p635_p3 = scmp.ne.s32.totalorder %s32_s25, %s634_s10  ;;  %p640_p5 = scmp.lt.s32.totalorder %s634_s10, %s634_s10 }
   0xd   :  { %p641_p6 = por %p640_p5, %p639_p4 }
   0xf   :  { %p642_p7 = pnand %p641_p6, %p635_p3 }
  0x11   :  { %645 = shalt.err (!%p642_p7)
}
  0x12   :  { %s743_s11 = smov 128   ;;  %s744_s12 = smov 8  }
  0x13   :  { %37 = dma.hbm_to_vmem [thread:$0]  %s901_s1, 2048, %s32_s25, [#allocation6], %s743_s11, %s743_s11, %s744_s12  }
  0x14   :  { %s745_s15 = smov [#allocation2]   ;;  %s746_s17 = smov [#allocation7]  }
  0x15   :  { %s22_s16 = sshll.u32 %s745_s15, 4  ;;  %s45_s18 = sshll.u32 %s746_s17, 4  ;;  %s23_s16 = int_to_ptr.vmem [resolvable:$true] %s22_s16  ;;  %s46_s18 = int_to_ptr.vmem [resolvable:$true] %s45_s18 }
  0x16   :  { %s646_s21 = scalar_lea.hbm %s900_s0, 128 }
  0x17   :  { %p647_p8 = scmp.ne.s32.totalorder %s900_s0, %s646_s21  ;;  %p650_p9 = scmp.lt.u32.totalorder %s646_s21, %s900_s0 }
  0x19   :  { %p652_p10 = pnand %p650_p9, %p647_p8 }
  0x1b   :  { %655 = shalt.err (!%p652_p10)
}
  0x1c   :  { %s656_s1 = scalar_lea.vmem %s23_s16, 128  ;;  %p661_p12 = scmp.lt.s32.totalorder %s23_s16, %s23_s16 }
  0x1d   :  { %p657_p11 = scmp.ne.s32.totalorder %s23_s16, %s656_s1  ;;  %p662_p13 = scmp.lt.s32.totalorder %s656_s1, %s656_s1 }
  0x1f   :  { %p663_p0 = por %p662_p13, %p661_p12 }
  0x21   :  { %p664_p1 = pnand %p663_p0, %p657_p11 }
  0x23   :  { %667 = shalt.err (!%p664_p1)
}
  0x24   :  { %25 = dma.hbm_to_vmem [thread:$0]  %s900_s0, 128, %s23_s16, [#allocation3]  }
  0x25   :  { %s668_s30 = scalar_lea.hbm %s903_s3, 2048 }
  0x26   :  { %p669_p2 = scmp.ne.s32.totalorder %s903_s3, %s668_s30  ;;  %p672_p3 = scmp.lt.u32.totalorder %s668_s30, %s903_s3 }
  0x28   :  { %p674_p4 = pnand %p672_p3, %p669_p2 }
  0x2a   :  { %677 = shalt.err (!%p674_p4)
}
  0x2b   :  { %s678_s14 = scalar_lea.vmem %s46_s18, 2048  ;;  %p683_p6 = scmp.lt.s32.totalorder %s46_s18, %s46_s18 }
  0x2c   :  { %p679_p5 = scmp.ne.s32.totalorder %s46_s18, %s678_s14  ;;  %p684_p7 = scmp.lt.s32.totalorder %s678_s14, %s678_s14 }
  0x2e   :  { %p685_p8 = por %p684_p7, %p683_p6 }
  0x30   :  { %p686_p9 = pnand %p685_p8, %p679_p5 }
  0x32   :  { %689 = shalt.err (!%p686_p9)
}
  0x33   :  { %51 = dma.hbm_to_vmem [thread:$0]  %s903_s3, 2048, %s46_s18, [#allocation6], %s743_s11, %s743_s11, %s744_s12  }
  0x34   :  { %s747_s16 = smov [#allocation8]   ;;  %s690_s21 = scalar_lea.hbm %s905_s5, 2048 }
  0x35   :  { %s59_s17 = sshll.u32 %s747_s16, 4  ;;  %p691_p10 = scmp.ne.s32.totalorder %s905_s5, %s690_s21  ;;  %s60_s17 = int_to_ptr.vmem [resolvable:$true] %s59_s17 }
  0x36   :  { %p694_p11 = scmp.lt.u32.totalorder %s690_s21, %s905_s5 }
  0x38   :  { %p696_p12 = pnand %p694_p11, %p691_p10 }
  0x3a   :  { %699 = shalt.err (!%p696_p12)
}
  0x3b   :  { %s700_s1 = scalar_lea.vmem %s60_s17, 2048  ;;  %p705_p0 = scmp.lt.s32.totalorder %s60_s17, %s60_s17 }
  0x3c   :  { %p701_p13 = scmp.ne.s32.totalorder %s60_s17, %s700_s1  ;;  %p706_p1 = scmp.lt.s32.totalorder %s700_s1, %s700_s1 }
  0x3e   :  { %p707_p2 = por %p706_p1, %p705_p0 }
  0x40   :  { %p708_p3 = pnand %p707_p2, %p701_p13 }
  0x42   :  { %711 = shalt.err (!%p708_p3)
}
  0x43   :  { %65 = dma.hbm_to_vmem [thread:$0]  %s905_s5, 2048, %s60_s17, [#allocation9], %s743_s11, %s743_s11, %s744_s12  }
  0x44   :  { %734 = dma.done.wait [#allocation3], 128  }
  0x45   :  { %735 = vsyncadd [#allocation3], 4294967168 }
  0x46   :  { %736 = dma.done.wait [#allocation6], 4096  }
  0x47   :  { %737 = vsyncadd [#allocation6], 4294963200 }
  0x48   :  { %738 = dma.done.wait [#allocation9], 2048  }
  0x49   :  { %739 = vsyncadd [#allocation9], 4294965248  ;;  %v748_v0 = vmov 0.0|0.0   ;;  %vm749_vm0 = vmmov 0   ;;  %v750_v1 = vmov 0.0   ;;  %v81_v2 = vld [vmem:[#allocation5] sm:$0xff] }
  0x4a   :  { %540 = vmatprep.subr.bf16.mxu0 %v748_v0  ;;  %467 = vmatprep.mubr.msk.f32.mxu0 %vm749_vm0, %v750_v1  ;;  %v82_v3 = vld [vmem:[#allocation5 + $0x8] sm:$0xff]  ;;  %v83_v4 = vld [vmem:[#allocation5 + $0x10] sm:$0xff]  ;;  %v84_v6 = vld [vmem:[#allocation5 + $0x18] sm:$0xff]  ;;  %s751_s28 = smov [#allocation10]  }
  0x4b   :  { %564 = vmatprep.subr.bf16.mxu1 %v748_v0  ;;  %502 = vmatprep.mubr.msk.f32.mxu1 %vm749_vm0, %v750_v1  ;;  %v541_v5 = vpack.c.bf16 %v82_v3, %v81_v2  ;;  %v544_v7 = vpack.c.bf16 %v84_v6, %v83_v4  ;;  %v85_v8 = vld [vmem:[#allocation5 + $0x20] sm:$0xff]  ;;  %v86_v9 = vld [vmem:[#allocation5 + $0x28] sm:$0xff]  ;;  %v177_v12 = vld [vmem:[#allocation7 + $0x10] sm:$0xff]  ;;  %s370_s29 = sshll.u32 %s751_s28, 4  ;;  %s371_s29 = int_to_ptr.vmem [resolvable:$true] %s370_s29 }
  0x4c   :  { %v175_v10 = vld [vmem:[#allocation7] sm:$0xff]  ;;  %v176_v11 = vld [vmem:[#allocation7 + $0x8] sm:$0xff]  ;;  %v178_v13 = vld [vmem:[#allocation7 + $0x18] sm:$0xff]  ;;  %v547_v14 = vpack.c.bf16 %v86_v9, %v85_v8  ;;  %s712_s30 = scalar_lea.vmem %s371_s29, 128  ;;  %p717_p5 = scmp.lt.s32.totalorder %s371_s29, %s371_s29 }
  0x4d   :  { %542 = vmatpush3.bf16.msra.mxu0 %v541_v5  ;;  %v565_v15 = vpack.c.bf16 %v176_v11, %v175_v10  ;;  %v87_v16 = vld [vmem:[#allocation5 + $0x30] sm:$0xff]  ;;  %v88_v17 = vld [vmem:[#allocation5 + $0x38] sm:$0xff]  ;;  %v568_v18 = vpack.c.bf16 %v178_v13, %v177_v12  ;;  %v179_v19 = vld [vmem:[#allocation7 + $0x20] sm:$0xff]  ;;  %p713_p4 = scmp.ne.s32.totalorder %s371_s29, %s712_s30  ;;  %p718_p6 = scmp.lt.s32.totalorder %s712_s30, %s712_s30 }
  0x4e   :  { %543 = vmatprep.subr.bf16.mxu0 %v748_v0  ;;  %v180_v20 = vld [vmem:[#allocation7 + $0x28] sm:$0xff]  ;;  %v550_v21 = vpack.c.bf16 %v88_v17, %v87_v16  ;;  %v89_v22 = vld [vmem:[#allocation5 + $0x40] sm:$0xff]  ;;  %v181_v25 = vld [vmem:[#allocation7 + $0x30] sm:$0xff] }
  0x4f   :  { %566 = vmatpush3.bf16.msra.mxu1 %v565_v15  ;;  %v90_v23 = vld [vmem:[#allocation5 + $0x48] sm:$0xff]  ;;  %v571_v24 = vpack.c.bf16 %v180_v20, %v179_v19  ;;  %v182_v26 = vld [vmem:[#allocation7 + $0x38] sm:$0xff]  ;;  %v91_v28 = vld [vmem:[#allocation5 + $0x50] sm:$0xff]  ;;  %p719_p7 = por %p718_p6, %p717_p5 }
  0x50   :  { %567 = vmatprep.subr.bf16.mxu1 %v748_v0  ;;  %v553_v27 = vpack.c.bf16 %v90_v23, %v89_v22  ;;  %v92_v29 = vld [vmem:[#allocation5 + $0x58] sm:$0xff]  ;;  %v574_v30 = vpack.c.bf16 %v182_v26, %v181_v25  ;;  %v183_v31 = vld [vmem:[#allocation7 + $0x40] sm:$0xff]  ;;  %v184_v32 = vld [vmem:[#allocation7 + $0x48] sm:$0xff] }
  0x51   :  { %545 = vmatpush3.bf16.msra.mxu0 %v544_v7  ;;  %v556_v33 = vpack.c.bf16 %v92_v29, %v91_v28  ;;  %v93_v34 = vld [vmem:[#allocation5 + $0x60] sm:$0xff]  ;;  %v94_v35 = vld [vmem:[#allocation5 + $0x68] sm:$0xff]  ;;  %v577_v36 = vpack.c.bf16 %v184_v32, %v183_v31  ;;  %v185_v37 = vld [vmem:[#allocation7 + $0x50] sm:$0xff]  ;;  %p720_p8 = pnand %p719_p7, %p713_p4 }
  0x52   :  { %546 = vmatprep.subr.bf16.mxu0 %v748_v0  ;;  %v186_v38 = vld [vmem:[#allocation7 + $0x58] sm:$0xff]  ;;  %v559_v39 = vpack.c.bf16 %v94_v35, %v93_v34  ;;  %v95_v40 = vld [vmem:[#allocation5 + $0x70] sm:$0xff]  ;;  %v187_v43 = vld [vmem:[#allocation7 + $0x60] sm:$0xff] }
  0x53   :  { %569 = vmatpush3.bf16.msra.mxu1 %v568_v18  ;;  %v96_v41 = vld [vmem:[#allocation5 + $0x78] sm:$0xff]  ;;  %v580_v42 = vpack.c.bf16 %v186_v38, %v185_v37  ;;  %v188_v44 = vld [vmem:[#allocation7 + $0x68] sm:$0xff]  ;;  %v189_v48 = vld [vmem:[#allocation7 + $0x70] sm:$0xff] }
  0x54   :  { %570 = vmatprep.subr.bf16.mxu1 %v748_v0  ;;  %v562_v45 = vpack.c.bf16 %v96_v41, %v95_v40  ;;  %v583_v46 = vpack.c.bf16 %v188_v44, %v187_v43  ;;  %v80_v47 = vld [vmem:[#allocation2] sm:$0xff]  ;;  %v269_v51 = vld [vmem:[#allocation8] sm:$0xff]  ;;  %v270_v52 = vld [vmem:[#allocation8 + $0x8] sm:$0xff] }
  0x55   :  { %548 = vmatpush3.bf16.msra.mxu0 %v547_v14  ;;  %v190_v49 = vld [vmem:[#allocation7 + $0x78] sm:$0xff]  ;;  %v271_v53 = vld [vmem:[#allocation8 + $0x10] sm:$0xff]  ;;  %v589_v54 = vpack.c.bf16 %v270_v52, %v269_v51  ;;  %v273_v57 = vld [vmem:[#allocation8 + $0x20] sm:$0xff] }
  0x56   :  { %549 = vmatprep.subr.bf16.mxu0 %v748_v0  ;;  %v586_v50 = vpack.c.bf16 %v190_v49, %v189_v48  ;;  %v272_v55 = vld [vmem:[#allocation8 + $0x18] sm:$0xff]  ;;  %v274_v58 = vld [vmem:[#allocation8 + $0x28] sm:$0xff]  ;;  %v275_v60 = vld [vmem:[#allocation8 + $0x30] sm:$0xff] }
  0x57   :  { %572 = vmatpush3.bf16.msra.mxu1 %v571_v24  ;;  %v592_v56 = vpack.c.bf16 %v272_v55, %v271_v53  ;;  %v595_v59 = vpack.c.bf16 %v274_v58, %v273_v57  ;;  %v276_v61 = vld [vmem:[#allocation8 + $0x38] sm:$0xff]  ;;  %v277_v63 = vld [vmem:[#allocation8 + $0x40] sm:$0xff]  ;;  %v279_v3 = vld [vmem:[#allocation8 + $0x50] sm:$0xff] }
  0x58   :  { %573 = vmatprep.subr.bf16.mxu1 %v748_v0  ;;  %v598_v62 = vpack.c.bf16 %v276_v61, %v275_v60  ;;  %v280_v4 = vld [vmem:[#allocation8 + $0x58] sm:$0xff]  ;;  %v281_v6 = vld [vmem:[#allocation8 + $0x60] sm:$0xff]  ;;  %v282_v7 = vld [vmem:[#allocation8 + $0x68] sm:$0xff] }
  0x59   :  { %551 = vmatpush3.bf16.msra.mxu0 %v550_v21  ;;  %v604_v5 = vpack.c.bf16 %v280_v4, %v279_v3  ;;  %v607_v8 = vpack.c.bf16 %v282_v7, %v281_v6  ;;  %v381_v9 = vld [vmem:[%s902_s2] ss:$0 sm:$0xff]  ;;  %v283_v14 = vld [vmem:[#allocation8 + $0x70] sm:$0xff] }
  0x5a   :  { %552 = vmatprep.subr.bf16.mxu0 %v748_v0  ;;  %v284_v15 = vld [vmem:[#allocation8 + $0x78] sm:$0xff] }
  0x5b   :  { %575 = vmatpush3.bf16.msra.mxu1 %v574_v30  ;;  %v610_v16 = vpack.c.bf16 %v284_v15, %v283_v14  ;;  %v382_v17 = vld [vmem:[%s904_s4] ss:$0 sm:$0xff] }
  0x5c   :  { %576 = vmatprep.subr.bf16.mxu1 %v748_v0  ;;  %v383_v21 = vld [vmem:[%s906_s6] ss:$0 sm:$0xff] }
  0x5d   :  { %554 = vmatpush3.bf16.msra.mxu0 %v553_v27 }
  0x5e   :  { %555 = vmatprep.subr.bf16.mxu0 %v748_v0 }
  0x5f   :  { %578 = vmatpush3.bf16.msra.mxu1 %v577_v36 }
  0x60   :  { %579 = vmatprep.subr.bf16.mxu1 %v748_v0 }
  0x61   :  { %557 = vmatpush3.bf16.msra.mxu0 %v556_v33 }
  0x62   :  { %558 = vmatprep.subr.bf16.mxu0 %v748_v0 }
  0x63   :  { %581 = vmatpush3.bf16.msra.mxu1 %v580_v42 }
  0x64   :  { %582 = vmatprep.subr.bf16.mxu1 %v748_v0 }
  0x65   :  { %560 = vmatpush3.bf16.msra.mxu0 %v559_v39 }
  0x66   :  { %561 = vmatprep.subr.bf16.mxu0 %v748_v0 }
  0x67   :  { %584 = vmatpush3.bf16.msra.mxu1 %v583_v46 }
  0x68   :  { %585 = vmatprep.subr.bf16.mxu1 %v748_v0 }
  0x69   :  { %563 = vmatpush3.bf16.msra.mxu0 %v562_v45 }
  0x6a   :  { %588 = vmatprep.subr.bf16.mxu0 %v748_v0 }
  0x6b   :  { %587 = vmatpush3.bf16.msra.mxu1 %v586_v50 }
  0x6c   :  { %468 = vmatmul.mubr.f32.vlgmr.msra.gmra.mrb[0].mxu0 %v80_v47 }
  0x6d   :  { %537 = vmatprep.mubr.msk.f32.mxu0 %vm749_vm0, %v750_v1  ;;  %590 = vmatpush3.bf16.msra.mxu0 %v589_v54  ;;  %v278_v1 = vld [vmem:[#allocation8 + $0x48] sm:$0xff] }
  0x6e   :  { %591 = vmatprep.subr.bf16.mxu0 %v748_v0  ;;  %v601_v2 = vpack.c.bf16 %v278_v1, %v277_v63 }
  0x71   :  { %593 = vmatpush3.bf16.msra.mxu0 %v592_v56 }
  0x72   :  { %594 = vmatprep.subr.bf16.mxu0 %v748_v0 }
  0x75   :  { %596 = vmatpush3.bf16.msra.mxu0 %v595_v59 }
  0x76   :  { %597 = vmatprep.subr.bf16.mxu0 %v748_v0 }
  0x79   :  { %599 = vmatpush3.bf16.msra.mxu0 %v598_v62 }
  0x7a   :  { %600 = vmatprep.subr.bf16.mxu0 %v748_v0 }
  0x7d   :  { %602 = vmatpush3.bf16.msra.mxu0 %v601_v2 }
  0x7e   :  { %603 = vmatprep.subr.bf16.mxu0 %v748_v0 }
  0x81   :  { %605 = vmatpush3.bf16.msra.mxu0 %v604_v5 }
  0x82   :  { %606 = vmatprep.subr.bf16.mxu0 %v748_v0 }
  0x85   :  { %608 = vmatpush3.bf16.msra.mxu0 %v607_v8 }
  0x86   :  { %609 = vmatprep.subr.bf16.mxu0 %v748_v0 }
  0x89   :  { %611 = vmatpush3.bf16.msra.mxu0 %v610_v16 }
 0x13f   :  { %v170_v10 = vpop.f32.mrb[0].mxu0 }
 0x140   :  { %v171_v11 = vadd.f32 %v381_v9, %v170_v10  ;;  %v469_v12 = vpop.f32.mrb[1].mxu0 }
 0x142   :  { %v174_v13 = vmax.f32 %v171_v11, 0.0 }
 0x144   :  { %503 = vmatmul.mubr.f32.vlgmr.msra.gmra.mrb[0].mxu1 %v174_v13 }
 0x217   :  { %v264_v18 = vpop.f32.mrb[0].mxu1 }
 0x218   :  { %v265_v19 = vadd.f32 %v382_v17, %v264_v18  ;;  %v504_v0 = vpop.f32.mrb[1].mxu1 }
 0x21a   :  { %v268_v20 = vmax.f32 %v265_v19, 0.0 }
 0x21c   :  { %538 = vmatmul.mubr.f32.vlgmr.msra.gmra.mrb[2].mxu0 %v268_v20 }
 0x2ef   :  { %v358_v22 = vpop.f32.mrb[2].mxu0 }
 0x2f0   :  { %v359_v23 = vadd.f32 %v383_v21, %v358_v22  ;;  %v539_v24 = vpop.f32.mrb[3].mxu0 }
 0x2f2   :  { %622 = vtanh.f32 %v359_v23 }
 0x2fc   :  { %v623_v25 = vpop.eup %622 }
 0x2fd   :  { %363 = vst [vmem:[#allocation10] sm:$0xff] %v623_v25 }
 0x2fe   :  { %723 = shalt.err (!%p720_p8)
}
 0x2ff   :  { %s724_s6 = scalar_lea.hbm %s907_s7, 128 }
 0x300   :  { %p725_p9 = scmp.ne.s32.totalorder %s907_s7, %s724_s6  ;;  %p728_p10 = scmp.lt.u32.totalorder %s724_s6, %s907_s7 }
 0x302   :  { %p730_p11 = pnand %p728_p10, %p725_p9 }
 0x304   :  { %733 = shalt.err (!%p730_p11)
}
 0x305   :  { %373 = dma.vmem_to_hbm [thread:$0]  %s371_s29, 128, %s907_s7, [#allocation4]  }
 0x306   :  { %740 = dma.done.wait [#allocation4], 128  }
 0x307   :  { %741 = vsyncadd [#allocation4], 4294967168 }
 0x308   :  { %377 = vsyncpa [#allocation3], 1 }
 0x309   :  { %378 = vsyncpa [#allocation6], 1 }
 0x30a   :  { %379 = vsyncpa [#allocation9], 1 }
 0x30b   :  { %380 = vsyncpa [#allocation4], 1 }

</bundles_post_ra>
